<compile_context>
chip_gen: v5e
topology: v5e:2x2
jax: 0.10.0
libtpu: 0.0.40
codegen_flags: <defaults>
</compile_context>

<pallas_src>
import functools
import math

import jax
import jax.numpy as jnp
from jax.experimental import pallas as pl
from jax.experimental.pallas import tpu as pltpu


def _hw_budgets():
    """(target block bytes, vmem limit bytes), tuned per TPU generation."""
    try:
        vmem = int(pltpu.get_tpu_info().vmem_capacity_bytes)
    except Exception:
        vmem = 64 << 20
    if vmem <= (64 << 20):          # v7x-class: 64 MiB VMEM, 3.2 TB/s HBM
        return 6 << 20, 44 << 20
    return 8 << 20, 64 << 20        # v5e / v6e: 128 MiB physical VMEM


def _coalesce(shape, dims):
    """Merge input axes that stay adjacent & in-order under the permutation."""
    groups = []
    for d in dims:
        if groups and d == groups[-1][-1] + 1:
            groups[-1].append(d)
        else:
            groups.append([d])
    in_order = sorted(groups, key=lambda g: g[0])
    new_shape = tuple(int(math.prod(shape[a] for a in g)) for g in in_order)
    new_dims = tuple(in_order.index(g) for g in groups)
    return new_shape, new_dims


def _pick_tile(extent, cap_elems, constrained):
    """Tile size for one gridded axis (partial final block allowed)."""
    extent = int(extent)
    cap = max(1, min(extent, int(cap_elems)))
    if cap >= extent:
        return extent
    if not constrained:
        return cap                       # outer axis: any tile, cdiv grid
    if extent <= 128:
        return extent                    # full extent satisfies the (8,128) rule
    return max((cap // 128) * 128, 128)  # 128-multiples keep lane+sublane align


def _transpose_kernel(x_ref, o_ref, *, perm):
    o_ref[...] = jnp.transpose(x_ref[...], perm)


def _transpose_pack_kernel(x_ref, o_ref, *, perm):
    # Transpose, then re-lay the narrow-minor result out as full
    # (sublane x 128-lane) rows so stores are unmasked wide vst's.
    y = jnp.transpose(x_ref[...], perm)
    o_ref[...] = y.reshape(o_ref.shape)


@functools.lru_cache(maxsize=None)
def _build_swap(shape, dtype, dims):
    ndim = len(shape)
    if dims == tuple(range(ndim)):
        return jax.jit(lambda x: x)      # identity permutation

    target_bytes, vmem_limit = _hw_budgets()
    itemsize = jnp.dtype(dtype).itemsize

    cshape, cdims = _coalesce(shape, dims)
    k = len(cshape)
    out_cshape = tuple(cshape[d] for d in cdims)
    out_full = tuple(shape[d] for d in dims)

    a0 = cdims[0]                        # input axis feeding output axis 0
    a1 = cdims[1]                        # input axis feeding output axis 1

    def constrained(ax, out_pos):
        # Axis lands in the last two dims of the input or of the output.
        return ax >= k - 2 or out_pos >= k - 2

    def compiler(n_grid):
        return pltpu.CompilerParams(
            dimension_semantics=("parallel",) * n_grid,
            vmem_limit_bytes=vmem_limit,
        )

    aval = jax.ShapeDtypeStruct(shape, dtype)

    # ---- lane-dense output slab: natural minor dim is narrow but the whole
    # trailing output product is a multiple of 128 -> store full 128-lane rows.
    flat_tail = int(math.prod(out_cshape[1:]))
    dense_ok = (out_cshape[-1] % 128 != 0) and (flat_tail % 128 == 0)
    if dense_ok:
        budget = max(1, target_bytes // (itemsize * flat_tail))
        t0 = _pick_tile(cshape[a0], budget, constrained(a0, 0))
        dense_ok = t0 * flat_tail * itemsize <= 2 * target_bytes
    if dense_ok:
        in_block = tuple(t0 if ax == a0 else cshape[ax] for ax in range(k))
        out_decl = (cshape[a0], flat_tail // 128, 128)
        grid = (pl.cdiv(cshape[a0], t0),)

        call = pl.pallas_call(
            functools.partial(_transpose_pack_kernel, perm=cdims),
            out_shape=jax.ShapeDtypeStruct(out_decl, dtype),
            grid_spec=pltpu.PrefetchScalarGridSpec(
                num_scalar_prefetch=0,
                grid=grid,
                in_specs=[pl.BlockSpec(
                    in_block,
                    lambda i, _a0=a0, _k=k: tuple(
                        i if ax == _a0 else 0 for ax in range(_k)))],
                out_specs=pl.BlockSpec(
                    (t0, flat_tail // 128, 128), lambda i: (i, 0, 0)),
            ),
            compiler_params=compiler(1),
        )

        def dense_fn(x):
            return call(x.reshape(cshape)).reshape(out_full)

        jfn = jax.jit(dense_fn)
        try:
            # Compile-time feature check (done once, cached via lru_cache).
            jfn.lower(aval).compile()
            return jfn
        except Exception:
            pass  # this Mosaic version rejects the relayout -> natural layout

    # ---- natural permuted layout, 2-D grid over output axes 0 and 1 ----
    base = int(math.prod(cshape[ax] for ax in range(k) if ax not in (a0, a1)))
    budget = max(1, target_bytes // (itemsize * max(1, base)))
    ext0, ext1 = cshape[a0], cshape[a1]
    cap1 = max(budget // min(ext0, budget), math.isqrt(budget), 1)
    t1 = _pick_tile(ext1, cap1, constrained(a1, 1))
    t0 = _pick_tile(ext0, max(1, budget // t1), constrained(a0, 0))

    in_block = tuple(
        t0 if ax == a0 else (t1 if ax == a1 else cshape[ax]) for ax in range(k))
    out_block = (t0, t1) + out_cshape[2:]
    grid = (pl.cdiv(ext0, t0), pl.cdiv(ext1, t1))

    call = pl.pallas_call(
        functools.partial(_transpose_kernel, perm=cdims),
        out_shape=jax.ShapeDtypeStruct(out_cshape, dtype),
        grid_spec=pltpu.PrefetchScalarGridSpec(
            num_scalar_prefetch=0,
            grid=grid,
            in_specs=[pl.BlockSpec(
                in_block,
                lambda i, j, _a0=a0, _a1=a1, _k=k: tuple(
                    i if ax == _a0 else (j if ax == _a1 else 0)
                    for ax in range(_k)))],
            out_specs=pl.BlockSpec(
                out_block, lambda i, j, _k=k: (i, j) + (0,) * (_k - 2)),
        ),
        compiler_params=compiler(2),
    )

    def natural_fn(x):
        return call(x.reshape(cshape)).reshape(out_full)

    return jax.jit(natural_fn)


def swap(x, dims):
    """Pallas TPU equivalent of torch.Tensor.permute(*dims)."""
    dims = tuple(int(d) for d in dims)
    assert sorted(dims) == list(range(x.ndim)), "dims must be a permutation"
    fn = _build_swap(tuple(int(s) for s in x.shape), jnp.dtype(x.dtype), dims)
    return fn(x)


if __name__ == "__main__":
    key = jax.random.PRNGKey(0)
    # Small NCHW feature map, as a conv layer would produce.
    x = jax.random.normal(key, (2, 4, 16, 16), dtype=jnp.float32)

    # NCHW -> NHWC (lane-dense output path).
    dims = (0, 2, 3, 1)
    out = jax.block_until_ready(swap(x, dims))
    ref = jnp.transpose(x, dims)
    assert out.shape == ref.shape and out.dtype == ref.dtype
    assert bool(jnp.array_equal(out, ref))

    # Leading-axis swap (natural-layout path).
    dims2 = (1, 0, 2, 3)
    out2 = jax.block_until_ready(swap(x, dims2))
    ref2 = jnp.transpose(x, dims2)
    assert out2.shape == ref2.shape and bool(jnp.array_equal(out2, ref2))

    print("KERNEL_OK")
</pallas_src>

<mosaic_0001>
module attributes {stable_mosaic.version = 11 : i64} {
  func.func @_transpose_kernel(%arg0: i32, %arg1: i32, %arg2: memref<2x4x256xf32, #tpu.memory_space<vmem>>, %arg3: memref<2x256x4xf32, #tpu.memory_space<vmem>>) attributes {dimension_semantics = [#tpu.dimension_semantics<parallel>, #tpu.dimension_semantics<parallel>], iteration_bounds = array<i64: 1, 1>, scalar_prefetch = 0 : i64, scratch_operands = 0 : i64, tpu.core_type = #tpu.core_type<tc>, window_params = [{transform_indices = @transform_0, window_bounds = array<i64: 2, 4, 256>}, {transform_indices = @transform_1, window_bounds = array<i64: 2, 256, 4>}]} {
    %c0 = arith.constant 0 : index
    %c0_0 = arith.constant 0 : index
    %c0_1 = arith.constant 0 : index
    %0 = vector.load %arg2[%c0, %c0_0, %c0_1] : memref<2x4x256xf32, #tpu.memory_space<vmem>>, vector<2x4x256xf32>
    %1 = tpu.transpose %0, [0, 2, 1] : vector<2x4x256xf32> -> vector<2x256x4xf32>
    %c0_2 = arith.constant 0 : index
    %c0_3 = arith.constant 0 : index
    %c0_4 = arith.constant 0 : index
    %2 = vector.load %arg3[%c0_2, %c0_3, %c0_4] : memref<2x256x4xf32, #tpu.memory_space<vmem>>, vector<2x256x4xf32>
    tpu.vector_store %arg3[%c0_2, %c0_3, %c0_4], %1 {strides = array<i32>} : memref<2x256x4xf32, #tpu.memory_space<vmem>>, vector<2x256x4xf32>,
    return
  }
  func.func @transform_0(%arg0: i32, %arg1: i32) -> (i32, i32, i32) {
    %c0_i32 = arith.constant 0 : i32
    %c0_i32_0 = arith.constant 0 : i32
    return %arg0, %c0_i32, %arg1 : i32, i32, i32
  }
  func.func @transform_1(%arg0: i32, %arg1: i32) -> (i32, i32, i32) {
    %c0_i32 = arith.constant 0 : i32
    %c0_i32_0 = arith.constant 0 : i32
    return %arg0, %arg1, %c0_i32 : i32, i32, i32
  }
}

</mosaic_0001>

<bundles_post_ra>
// kernel: natural_fn.1
= control target key start
LH: loop header
LB: loop body
LE: loop exit
PB: predicated region body
PF: predicated region fallthrough
CT: control target
= control target key end

     0   :  { %vm151_vm0 = vcmask 31744   ;;  %s493_s0 = inlined_call_operand.vmem [shape: f32[2,4,256], index: 0, kind: input, shape index: {}]   ;;  %s494_s1 = inlined_call_operand.vmem [shape: f32[2,256,4], index: 1, kind: output, shape index: {}]  }
   0x1   :  { %v9_v0 = vld [vmem:[%s493_s0 + $0x8] sm:$0xff]  ;;  %v8_v1 = vld [vmem:[%s493_s0] sm:$0xff] }
   0x2   :  { %16 = vst [vmem:[#allocation1 + $0x10] ss:$2 sm:$0xff] %v9_v0 }
   0x3   :  { %12 = vst [vmem:[#allocation1] ss:$2 sm:$0xff] %v8_v1 }
   0x9   :  { %v17_v2 = vld.sshfl [vmem:[#allocation1 + $0x10] sm:$0xff pattern:$0x75316420]  ;;  %v18_v4 = vld.sshfl [vmem:[#allocation1 + $0x18] sm:$0xff pattern:$0x75316420] }
   0xa   :  { %87 = vxpose.xlu1.b32.start.end [1/1] (short) %v17_v2, 128  ;;  %v13_v3 = vld.sshfl [vmem:[#allocation1] sm:$0xff pattern:$0x75316420]  ;;  %v14_v5 = vld.sshfl [vmem:[#allocation1 + $0x8] sm:$0xff pattern:$0x75316420] }
   0xb   :  { %23 = vxpose.xlu0.b32.start.end [1/1] (short) %v13_v3, 128 }
  0x8a   :  { %119 = vxpose.xlu1.b32.start.end [1/1] (short) %v18_v4, 128 }
  0x8b   :  { %55 = vxpose.xlu0.b32.start.end [1/1] (short) %v14_v5, 128 }
  0xae   :  { %v103_v6 = vpop.trf.xlu1 }
  0xaf   :  { %184 = vst.msk [vmem:[%s494_s1 + $0x100] sm:$0xff] %vm151_vm0, %v103_v6  ;;  %v39_v7 = vpop.trf.xlu0 }
  0xb0   :  { %152 = vst.msk [vmem:[%s494_s1] sm:$0xff] %vm151_vm0, %v39_v7 }
  0xb6   :  { %v104_v8 = vpop.trf.xlu1 }
  0xb7   :  { %185 = vst.msk [vmem:[%s494_s1 + $0x108] sm:$0xff] %vm151_vm0, %v104_v8  ;;  %v40_v9 = vpop.trf.xlu0 }
  0xb8   :  { %153 = vst.msk [vmem:[%s494_s1 + $0x8] sm:$0xff] %vm151_vm0, %v40_v9 }
  0xbe   :  { %v105_v10 = vpop.trf.xlu1 }
  0xbf   :  { %186 = vst.msk [vmem:[%s494_s1 + $0x110] sm:$0xff] %vm151_vm0, %v105_v10  ;;  %v41_v11 = vpop.trf.xlu0 }
  0xc0   :  { %154 = vst.msk [vmem:[%s494_s1 + $0x10] sm:$0xff] %vm151_vm0, %v41_v11 }
  0xc6   :  { %v106_v12 = vpop.trf.xlu1 }
  0xc7   :  { %187 = vst.msk [vmem:[%s494_s1 + $0x118] sm:$0xff] %vm151_vm0, %v106_v12  ;;  %v42_v13 = vpop.trf.xlu0 }
  0xc8   :  { %155 = vst.msk [vmem:[%s494_s1 + $0x18] sm:$0xff] %vm151_vm0, %v42_v13 }
  0xce   :  { %v107_v14 = vpop.trf.xlu1 }
  0xcf   :  { %188 = vst.msk [vmem:[%s494_s1 + $0x120] sm:$0xff] %vm151_vm0, %v107_v14  ;;  %v43_v15 = vpop.trf.xlu0 }
  0xd0   :  { %156 = vst.msk [vmem:[%s494_s1 + $0x20] sm:$0xff] %vm151_vm0, %v43_v15 }
  0xd6   :  { %v108_v16 = vpop.trf.xlu1 }
  0xd7   :  { %189 = vst.msk [vmem:[%s494_s1 + $0x128] sm:$0xff] %vm151_vm0, %v108_v16  ;;  %v44_v17 = vpop.trf.xlu0 }
  0xd8   :  { %157 = vst.msk [vmem:[%s494_s1 + $0x28] sm:$0xff] %vm151_vm0, %v44_v17 }
  0xde   :  { %v109_v18 = vpop.trf.xlu1 }
  0xdf   :  { %190 = vst.msk [vmem:[%s494_s1 + $0x130] sm:$0xff] %vm151_vm0, %v109_v18  ;;  %v45_v19 = vpop.trf.xlu0 }
  0xe0   :  { %158 = vst.msk [vmem:[%s494_s1 + $0x30] sm:$0xff] %vm151_vm0, %v45_v19 }
  0xe6   :  { %v110_v20 = vpop.trf.xlu1 }
  0xe7   :  { %191 = vst.msk [vmem:[%s494_s1 + $0x138] sm:$0xff] %vm151_vm0, %v110_v20  ;;  %v46_v21 = vpop.trf.xlu0 }
  0xe8   :  { %159 = vst.msk [vmem:[%s494_s1 + $0x38] sm:$0xff] %vm151_vm0, %v46_v21 }
  0xee   :  { %v111_v22 = vpop.trf.xlu1 }
  0xef   :  { %192 = vst.msk [vmem:[%s494_s1 + $0x140] sm:$0xff] %vm151_vm0, %v111_v22  ;;  %v47_v23 = vpop.trf.xlu0 }
  0xf0   :  { %160 = vst.msk [vmem:[%s494_s1 + $0x40] sm:$0xff] %vm151_vm0, %v47_v23 }
  0xf6   :  { %v112_v24 = vpop.trf.xlu1 }
  0xf7   :  { %193 = vst.msk [vmem:[%s494_s1 + $0x148] sm:$0xff] %vm151_vm0, %v112_v24  ;;  %v48_v25 = vpop.trf.xlu0 }
  0xf8   :  { %161 = vst.msk [vmem:[%s494_s1 + $0x48] sm:$0xff] %vm151_vm0, %v48_v25 }
  0xfe   :  { %v113_v26 = vpop.trf.xlu1 }
  0xff   :  { %194 = vst.msk [vmem:[%s494_s1 + $0x150] sm:$0xff] %vm151_vm0, %v113_v26  ;;  %v49_v27 = vpop.trf.xlu0 }
 0x100   :  { %162 = vst.msk [vmem:[%s494_s1 + $0x50] sm:$0xff] %vm151_vm0, %v49_v27 }
 0x106   :  { %v114_v28 = vpop.trf.xlu1 }
 0x107   :  { %195 = vst.msk [vmem:[%s494_s1 + $0x158] sm:$0xff] %vm151_vm0, %v114_v28  ;;  %v50_v29 = vpop.trf.xlu0 }
 0x108   :  { %163 = vst.msk [vmem:[%s494_s1 + $0x58] sm:$0xff] %vm151_vm0, %v50_v29 }
 0x10e   :  { %v115_v30 = vpop.trf.xlu1 }
 0x10f   :  { %196 = vst.msk [vmem:[%s494_s1 + $0x160] sm:$0xff] %vm151_vm0, %v115_v30  ;;  %v51_v31 = vpop.trf.xlu0 }
 0x110   :  { %164 = vst.msk [vmem:[%s494_s1 + $0x60] sm:$0xff] %vm151_vm0, %v51_v31 }
 0x116   :  { %v116_v32 = vpop.trf.xlu1 }
 0x117   :  { %197 = vst.msk [vmem:[%s494_s1 + $0x168] sm:$0xff] %vm151_vm0, %v116_v32  ;;  %v52_v33 = vpop.trf.xlu0 }
 0x118   :  { %165 = vst.msk [vmem:[%s494_s1 + $0x68] sm:$0xff] %vm151_vm0, %v52_v33 }
 0x11e   :  { %v117_v34 = vpop.trf.xlu1 }
 0x11f   :  { %198 = vst.msk [vmem:[%s494_s1 + $0x170] sm:$0xff] %vm151_vm0, %v117_v34  ;;  %v53_v35 = vpop.trf.xlu0 }
 0x120   :  { %166 = vst.msk [vmem:[%s494_s1 + $0x70] sm:$0xff] %vm151_vm0, %v53_v35 }
 0x126   :  { %v118_v36 = vpop.trf.xlu1 }
 0x127   :  { %199 = vst.msk [vmem:[%s494_s1 + $0x178] sm:$0xff] %vm151_vm0, %v118_v36  ;;  %v54_v37 = vpop.trf.xlu0 }
 0x128   :  { %167 = vst.msk [vmem:[%s494_s1 + $0x78] sm:$0xff] %vm151_vm0, %v54_v37 }
 0x12e   :  { %v135_v38 = vpop.trf.xlu1 }
 0x12f   :  { %200 = vst.msk [vmem:[%s494_s1 + $0x180] sm:$0xff] %vm151_vm0, %v135_v38  ;;  %v71_v39 = vpop.trf.xlu0 }
 0x130   :  { %168 = vst.msk [vmem:[%s494_s1 + $0x80] sm:$0xff] %vm151_vm0, %v71_v39 }
 0x136   :  { %v136_v40 = vpop.trf.xlu1 }
 0x137   :  { %201 = vst.msk [vmem:[%s494_s1 + $0x188] sm:$0xff] %vm151_vm0, %v136_v40  ;;  %v72_v41 = vpop.trf.xlu0 }
 0x138   :  { %169 = vst.msk [vmem:[%s494_s1 + $0x88] sm:$0xff] %vm151_vm0, %v72_v41 }
 0x13e   :  { %v137_v42 = vpop.trf.xlu1 }
 0x13f   :  { %202 = vst.msk [vmem:[%s494_s1 + $0x190] sm:$0xff] %vm151_vm0, %v137_v42  ;;  %v73_v43 = vpop.trf.xlu0 }
 0x140   :  { %170 = vst.msk [vmem:[%s494_s1 + $0x90] sm:$0xff] %vm151_vm0, %v73_v43 }
 0x146   :  { %v138_v44 = vpop.trf.xlu1 }
 0x147   :  { %203 = vst.msk [vmem:[%s494_s1 + $0x198] sm:$0xff] %vm151_vm0, %v138_v44  ;;  %v74_v45 = vpop.trf.xlu0 }
 0x148   :  { %171 = vst.msk [vmem:[%s494_s1 + $0x98] sm:$0xff] %vm151_vm0, %v74_v45 }
 0x14e   :  { %v139_v46 = vpop.trf.xlu1 }
 0x14f   :  { %204 = vst.msk [vmem:[%s494_s1 + $0x1a0] sm:$0xff] %vm151_vm0, %v139_v46  ;;  %v75_v47 = vpop.trf.xlu0 }
 0x150   :  { %172 = vst.msk [vmem:[%s494_s1 + $0xa0] sm:$0xff] %vm151_vm0, %v75_v47 }
 0x156   :  { %v140_v48 = vpop.trf.xlu1 }
 0x157   :  { %205 = vst.msk [vmem:[%s494_s1 + $0x1a8] sm:$0xff] %vm151_vm0, %v140_v48  ;;  %v76_v49 = vpop.trf.xlu0 }
 0x158   :  { %173 = vst.msk [vmem:[%s494_s1 + $0xa8] sm:$0xff] %vm151_vm0, %v76_v49 }
 0x15e   :  { %v141_v50 = vpop.trf.xlu1 }
 0x15f   :  { %206 = vst.msk [vmem:[%s494_s1 + $0x1b0] sm:$0xff] %vm151_vm0, %v141_v50  ;;  %v77_v51 = vpop.trf.xlu0 }
 0x160   :  { %174 = vst.msk [vmem:[%s494_s1 + $0xb0] sm:$0xff] %vm151_vm0, %v77_v51 }
 0x166   :  { %v142_v52 = vpop.trf.xlu1 }
 0x167   :  { %207 = vst.msk [vmem:[%s494_s1 + $0x1b8] sm:$0xff] %vm151_vm0, %v142_v52  ;;  %v78_v53 = vpop.trf.xlu0 }
 0x168   :  { %175 = vst.msk [vmem:[%s494_s1 + $0xb8] sm:$0xff] %vm151_vm0, %v78_v53 }
 0x16e   :  { %v143_v54 = vpop.trf.xlu1 }
 0x16f   :  { %208 = vst.msk [vmem:[%s494_s1 + $0x1c0] sm:$0xff] %vm151_vm0, %v143_v54  ;;  %v79_v55 = vpop.trf.xlu0 }
 0x170   :  { %176 = vst.msk [vmem:[%s494_s1 + $0xc0] sm:$0xff] %vm151_vm0, %v79_v55 }
 0x176   :  { %v144_v56 = vpop.trf.xlu1 }
 0x177   :  { %209 = vst.msk [vmem:[%s494_s1 + $0x1c8] sm:$0xff] %vm151_vm0, %v144_v56  ;;  %v80_v57 = vpop.trf.xlu0 }
 0x178   :  { %177 = vst.msk [vmem:[%s494_s1 + $0xc8] sm:$0xff] %vm151_vm0, %v80_v57 }
 0x17e   :  { %v145_v58 = vpop.trf.xlu1 }
 0x17f   :  { %210 = vst.msk [vmem:[%s494_s1 + $0x1d0] sm:$0xff] %vm151_vm0, %v145_v58  ;;  %v81_v59 = vpop.trf.xlu0 }
 0x180   :  { %178 = vst.msk [vmem:[%s494_s1 + $0xd0] sm:$0xff] %vm151_vm0, %v81_v59 }
 0x186   :  { %v146_v60 = vpop.trf.xlu1 }
 0x187   :  { %211 = vst.msk [vmem:[%s494_s1 + $0x1d8] sm:$0xff] %vm151_vm0, %v146_v60  ;;  %v82_v61 = vpop.trf.xlu0 }
 0x188   :  { %179 = vst.msk [vmem:[%s494_s1 + $0xd8] sm:$0xff] %vm151_vm0, %v82_v61 }
 0x18e   :  { %v147_v62 = vpop.trf.xlu1 }
 0x18f   :  { %212 = vst.msk [vmem:[%s494_s1 + $0x1e0] sm:$0xff] %vm151_vm0, %v147_v62  ;;  %v83_v63 = vpop.trf.xlu0 }
 0x190   :  { %180 = vst.msk [vmem:[%s494_s1 + $0xe0] sm:$0xff] %vm151_vm0, %v83_v63 }
 0x196   :  { %v148_v0 = vpop.trf.xlu1 }
 0x197   :  { %213 = vst.msk [vmem:[%s494_s1 + $0x1e8] sm:$0xff] %vm151_vm0, %v148_v0  ;;  %v84_v1 = vpop.trf.xlu0 }
 0x198   :  { %181 = vst.msk [vmem:[%s494_s1 + $0xe8] sm:$0xff] %vm151_vm0, %v84_v1 }
 0x19e   :  { %v149_v2 = vpop.trf.xlu1 }
 0x19f   :  { %214 = vst.msk [vmem:[%s494_s1 + $0x1f0] sm:$0xff] %vm151_vm0, %v149_v2  ;;  %v85_v3 = vpop.trf.xlu0 }
 0x1a0   :  { %182 = vst.msk [vmem:[%s494_s1 + $0xf0] sm:$0xff] %vm151_vm0, %v85_v3 }
 0x1a6   :  { %v150_v4 = vpop.trf.xlu1 }
 0x1a7   :  { %215 = vst.msk [vmem:[%s494_s1 + $0x1f8] sm:$0xff] %vm151_vm0, %v150_v4  ;;  %v86_v5 = vpop.trf.xlu0 }
 0x1a8   :  { %183 = vst.msk [vmem:[%s494_s1 + $0xf8] sm:$0xff] %vm151_vm0, %v86_v5 }

</bundles_post_ra>
